<compile_context>
chip_gen: v5e
topology: v5e:2x2
jax: 0.10.0
libtpu: 0.0.40
codegen_flags: <defaults>
</compile_context>

<pallas_src>
import jax
import jax.numpy as jnp
import numpy as np
from jax import lax
from jax.experimental import pallas as pl
from jax.experimental.pallas import tpu as pltpu

EPS_NORM = 1e-12   # F.normalize eps
BN_EPS = 1e-5      # nn.BatchNorm1d default eps


def _round_up(x, m):
    return ((x + m - 1) // m) * m


def _make_iti_head_kernel(B, offsets):
    """Kernel factory; static batch size and weight-slab row offsets baked in."""
    o_wt, o_ws1, o_ws2 = offsets

    def kernel(vis_ref, tpool_ref, wv_ref, wrest_ref, vec_ref, out_ref, acc_ref):
        k = pl.program_id(0)
        cdt = wv_ref.dtype                       # bf16 (perf) or f32 (parity)
        E_pad = out_ref.shape[1]
        Ct_rows = tpool_ref.shape[1]

        @pl.when(k == 0)
        def _init():
            acc_ref[...] = jnp.zeros_like(acc_ref)

        # ---- visual stream, this Cv tile ------------------------------------
        # AdaptiveAvgPool2d(1): mean over H*W in f32, then the partial embedding
        # matmul on the MXU, accumulated in f32 (next tile's DMA overlaps this).
        v_pool = jnp.mean(vis_ref[...].astype(jnp.float32), axis=-1)   # (B, tCv)
        acc_ref[...] += jnp.dot(v_pool.astype(cdt), wv_ref[...],
                                preferred_element_type=jnp.float32)

        @pl.when(k == pl.num_programs(0) - 1)
        def _finalize():
            # Embedding bias adds; stage both streams into static sublane slices
            # of the lane-dense output tile (no concatenate -> no relayout copy).
            out_ref[0:B, :] = acc_ref[...] + vec_ref[0:1, :]
            out_ref[B:2 * B, :] = (
                jnp.dot(tpool_ref[...], wrest_ref[o_wt:o_wt + Ct_rows, :],
                        preferred_element_type=jnp.float32) + vec_ref[1:2, :])
            x = out_ref[...]                                          # (2B, E) f32

            # F.normalize(p=2, dim=1): rsqrt (EUP) of the clamped sum of squares.
            # Clamping ss at EPS_NORM (== clamping ||x|| at 1e-6) is equivalent to
            # the reference for non-degenerate rows and avoids an f32 subnormal.
            ss = jnp.sum(x * x, axis=-1, keepdims=True)
            x = x * lax.rsqrt(jnp.maximum(ss, EPS_NORM))

            # Shared MLP: Linear -> ReLU -> Linear, once on the stacked streams.
            h = jnp.dot(x.astype(cdt), wrest_ref[o_ws1:o_ws1 + E_pad, :],
                        preferred_element_type=jnp.float32) + vec_ref[2:3, :]
            h = jnp.maximum(h, 0.0)
            x = jnp.dot(h.astype(cdt), wrest_ref[o_ws2:o_ws2 + E_pad, :],
                        preferred_element_type=jnp.float32) + vec_ref[3:4, :]

            # BNNeck (eval stats pre-folded to scale/shift); per-stream rows
            # selected with an iota mask instead of broadcast_to + concatenate.
            row = lax.broadcasted_iota(jnp.int32, (2 * B, E_pad), 0)
            is_vis = row < B
            scale = jnp.where(is_vis, vec_ref[4:5, :], vec_ref[6:7, :])
            shift = jnp.where(is_vis, vec_ref[5:6, :], vec_ref[7:8, :])
            out_ref[...] = x * scale + shift

    return kernel


def init_params(key, visual_size, textual_size, embed_size):
    """Deterministic params matching ITIHead._init_weight (kaiming fan_out, bias=0)."""
    ks = jax.random.split(key, 4)

    def kaiming_fan_out(k, fan_in, fan_out):
        std = (2.0 / fan_out) ** 0.5
        # PyTorch Linear weight is (out, in); stored transposed (in, out) for x @ W.
        return std * jax.random.normal(k, (fan_in, fan_out), jnp.float32)

    E = embed_size
    zeros_e = jnp.zeros((E,), jnp.float32)
    ones_e = jnp.ones((E,), jnp.float32)
    return dict(
        wv=kaiming_fan_out(ks[0], visual_size, E), bv=zeros_e,
        wt=kaiming_fan_out(ks[1], textual_size, E), bt=zeros_e,
        ws1=kaiming_fan_out(ks[2], E, E), bs1=zeros_e,
        ws2=kaiming_fan_out(ks[3], E, E), bs2=zeros_e,
        v_bn_gamma=ones_e, v_bn_beta=zeros_e, v_bn_mean=zeros_e, v_bn_var=ones_e,
        t_bn_gamma=ones_e, t_bn_beta=zeros_e, t_bn_mean=zeros_e, t_bn_var=ones_e,
    )


def iti_head_forward(visual_feature, textual_feature, params, *,
                     compute_dtype=jnp.bfloat16, tile_cv=256):
    """visual_feature: (B, Cv, H, W) NCHW;  textual_feature: (B, Ct, L) NCL."""
    B, Cv, H, W = visual_feature.shape
    _, Ct, L = textual_feature.shape
    E = params["wv"].shape[1]
    HW = H * W
    cdt = jnp.dtype(compute_dtype)

    E_pad = _round_up(E, 128)                      # lane-dense output / MXU N-dim
    Ct_pad = _round_up(Ct, 128)                    # lane-dense pooled text / K-dim
    tCv = min(_round_up(tile_cv, 8), _round_up(Cv, 8))
    Cv_pad = _round_up(Cv, tCv)
    n_cv_tiles = Cv_pad // tCv

    # ---- visual feature: (B, Cv, H, W) -> (B, Cv_pad, HW), compute dtype -------
    vis = visual_feature.reshape(B, Cv, HW)
    if Cv_pad != Cv:
        vis = jnp.pad(vis, ((0, 0), (0, Cv_pad - Cv), (0, 0)))
    vis = vis.astype(cdt)

    # ---- textual max-pool hoisted to the wrapper (fuses with upstream ops) -----
    t_pool = jnp.max(textual_feature.astype(jnp.float32), axis=-1)       # (B, Ct)
    if Ct_pad != Ct:
        t_pool = jnp.pad(t_pool, ((0, 0), (0, Ct_pad - Ct)))
    t_pool = t_pool.astype(cdt)

    # ---- BN eval-mode running stats folded to per-channel scale / shift --------
    def bn_fold(gamma, beta, mean, var):
        scale = gamma / jnp.sqrt(var + BN_EPS)
        return scale, beta - mean * scale

    v_scale, v_shift = bn_fold(params["v_bn_gamma"], params["v_bn_beta"],
                               params["v_bn_mean"], params["v_bn_var"])
    t_scale, t_shift = bn_fold(params["t_bn_gamma"], params["t_bn_beta"],
                               params["t_bn_mean"], params["t_bn_var"])

    # ---- weights: zero-pad to lane/sublane-aligned shapes, pack the small ones -
    def pad2(w, rows, cols):
        w = w.astype(jnp.float32)
        return jnp.pad(w, ((0, rows - w.shape[0]), (0, cols - w.shape[1])))

    wv_p = pad2(params["wv"], Cv_pad, E_pad).astype(cdt)            # tiled over rows
    w_rest = jnp.concatenate([pad2(params["wt"], Ct_pad, E_pad),
                              pad2(params["ws1"], E_pad, E_pad),
                              pad2(params["ws2"], E_pad, E_pad)], axis=0).astype(cdt)
    o_wt, o_ws1, o_ws2 = 0, Ct_pad, Ct_pad + E_pad
    rest_rows = w_rest.shape[0]

    def pad1(v):
        return jnp.pad(v.astype(jnp.float32), (0, E_pad - v.shape[0]))

    vec_pack = jnp.stack([pad1(params["bv"]), pad1(params["bt"]),
                          pad1(params["bs1"]), pad1(params["bs2"]),
                          pad1(v_scale), pad1(v_shift),
                          pad1(t_scale), pad1(t_shift)], axis=0)        # (8, E_pad) f32

    # ---- VMEM budget derived from the actual (double-buffered) blocks ----------
    csz = cdt.itemsize
    block_bytes = [B * tCv * HW * csz,            # visual tile
                   B * Ct_pad * csz,              # pooled text
                   tCv * E_pad * csz,             # wv tile
                   rest_rows * E_pad * csz,       # wt|ws1|ws2 slab
                   8 * E_pad * 4,                 # biases + BN scale/shift
                   2 * B * E_pad * 4,             # output tile
                   B * E_pad * 4]                 # accumulator scratch
    vmem_limit = int(min(max(3 * sum(block_bytes) + (2 << 20), 8 << 20), 48 << 20))

    kernel = _make_iti_head_kernel(B, (o_wt, o_ws1, o_ws2))

    out = pl.pallas_call(
        kernel,
        out_shape=jax.ShapeDtypeStruct((2 * B, E_pad), jnp.float32),
        grid=(n_cv_tiles,),
        in_specs=[
            pl.BlockSpec((B, tCv, HW), lambda k: (0, k, 0)),        # vis tiles
            pl.BlockSpec((B, Ct_pad), lambda k: (0, 0)),            # pooled text
            pl.BlockSpec((tCv, E_pad), lambda k: (k, 0)),           # wv row tiles
            pl.BlockSpec((rest_rows, E_pad), lambda k: (0, 0)),     # wt|ws1|ws2 slab
            pl.BlockSpec((8, E_pad), lambda k: (0, 0)),             # biases + BN
        ],
        out_specs=pl.BlockSpec((2 * B, E_pad), lambda k: (0, 0)),
        scratch_shapes=[pltpu.VMEM((B, E_pad), jnp.float32)],
        compiler_params=pltpu.CompilerParams(
            dimension_semantics=("arbitrary",),                     # Cv reduction
            vmem_limit_bytes=vmem_limit),
    )(vis, t_pool, wv_p, w_rest, vec_pack)

    # Split the stacked output back into [visual_embed_bn, textual_embed_bn].
    return [out[:B, :E], out[B:, :E]]


def iti_head_reference(visual_feature, textual_feature, params):
    """Pure-JAX f32 reference mirroring the PyTorch eval forward."""
    B, Cv, H, W = visual_feature.shape
    v_pool = jnp.mean(visual_feature.reshape(B, Cv, H * W), axis=-1)
    t_pool = jnp.max(textual_feature, axis=-1)
    v = v_pool @ params["wv"] + params["bv"]
    t = t_pool @ params["wt"] + params["bt"]

    def l2norm(x):
        return x / jnp.maximum(jnp.linalg.norm(x, axis=-1, keepdims=True), EPS_NORM)

    def shared(x):
        h = jnp.maximum(x @ params["ws1"] + params["bs1"], 0.0)
        return h @ params["ws2"] + params["bs2"]

    v = shared(l2norm(v))
    t = shared(l2norm(t))

    def bn(x, g, b, m, var):
        return (x - m) / jnp.sqrt(var + BN_EPS) * g + b

    v = bn(v, params["v_bn_gamma"], params["v_bn_beta"],
           params["v_bn_mean"], params["v_bn_var"])
    t = bn(t, params["t_bn_gamma"], params["t_bn_beta"],
           params["t_bn_mean"], params["t_bn_var"])
    return [v, t]


if __name__ == "__main__":
    B, Cv, H, W = 2, 48, 16, 16        # visual backbone feature map (NCHW)
    Ct, L = 64, 8                      # textual feature (N, C, L)
    E = 32                             # cfg.MODEL.EMBEDDING.FEATURE_SIZE

    key = jax.random.PRNGKey(0)
    k_v, k_t, k_p = jax.random.split(key, 3)
    visual_feature = jax.random.normal(k_v, (B, Cv, H, W), jnp.float32)
    textual_feature = jax.random.normal(k_t, (B, Ct, L), jnp.float32)
    params = init_params(k_p, visual_size=Cv, textual_size=Ct, embed_size=E)

    ref = iti_head_reference(visual_feature, textual_feature, params)

    # Perf path: bf16 dot operands, f32 accumulation/elementwise. tile_cv=16 forces
    # a multi-step pipelined Cv reduction even at these toy shapes.
    out_bf16 = iti_head_forward(visual_feature, textual_feature, params,
                                compute_dtype=jnp.bfloat16, tile_cv=16)
    out_bf16 = jax.block_until_ready(out_bf16)

    # Exact-parity path: f32 end to end, must match the f32 reference tightly.
    out_f32 = iti_head_forward(visual_feature, textual_feature, params,
                               compute_dtype=jnp.float32, tile_cv=16)
    out_f32 = jax.block_until_ready(out_f32)

    for o, r in zip(out_f32, ref):
        np.testing.assert_allclose(np.asarray(o), np.asarray(r), rtol=1e-5, atol=1e-5)
    for o, r in zip(out_bf16, ref):   # bf16 operand rounding -> looser sanity check
        np.testing.assert_allclose(np.asarray(o), np.asarray(r), rtol=5e-2, atol=5e-2)

    print("KERNEL_OK")
</pallas_src>

<mosaic_0001>
module attributes {stable_mosaic.version = 11 : i64} {
  func.func @kernel(%arg0: i32, %arg1: memref<2x16x256xbf16, #tpu.memory_space<vmem>>, %arg2: memref<2x128xbf16, #tpu.memory_space<vmem>>, %arg3: memref<16x128xbf16, #tpu.memory_space<vmem>>, %arg4: memref<384x128xbf16, #tpu.memory_space<vmem>>, %arg5: memref<8x128xf32, #tpu.memory_space<vmem>>, %arg6: memref<4x128xf32, #tpu.memory_space<vmem>>, %arg7: memref<2x128xf32, #tpu.memory_space<vmem>>) attributes {dimension_semantics = [#tpu.dimension_semantics<arbitrary>], iteration_bounds = array<i64: 3>, scalar_prefetch = 0 : i64, scratch_operands = 1 : i64, tpu.core_type = #tpu.core_type<tc>, window_params = [{transform_indices = @transform_0, window_bounds = array<i64: 2, 16, 256>}, {pipeline_mode = #tpu.pipeline_mode<synchronous>, transform_indices = @transform_1, window_bounds = array<i64: 2, 128>}, {transform_indices = @transform_2, window_bounds = array<i64: 16, 128>}, {pipeline_mode = #tpu.pipeline_mode<synchronous>, transform_indices = @transform_3, window_bounds = array<i64: 384, 128>}, {pipeline_mode = #tpu.pipeline_mode<synchronous>, transform_indices = @transform_4, window_bounds = array<i64: 8, 128>}, {pipeline_mode = #tpu.pipeline_mode<synchronous>, transform_indices = @transform_5, window_bounds = array<i64: 4, 128>}]} {
    %c0_i32 = arith.constant 0 : i32
    %0 = arith.cmpi eq, %arg0, %c0_i32 : i32
    %1 = arith.extui %0 : i1 to i32
    %c0_i32_0 = arith.constant 0 : i32
    %2 = arith.cmpi ne, %1, %c0_i32_0 : i32
    scf.if %2 {
      %cst_12 = arith.constant 0.000000e+00 : f32
      %17 = vector.broadcast %cst_12 : f32 to vector<2x128xf32>
      %c0_13 = arith.constant 0 : index
      %c0_14 = arith.constant 0 : index
      %18 = vector.load %arg7[%c0_13, %c0_14] : memref<2x128xf32, #tpu.memory_space<vmem>>, vector<2x128xf32>
      tpu.vector_store %arg7[%c0_13, %c0_14], %17 {strides = array<i32>} : memref<2x128xf32, #tpu.memory_space<vmem>>, vector<2x128xf32>,
    } else {
    }
    %c0 = arith.constant 0 : index
    %c0_1 = arith.constant 0 : index
    %c0_2 = arith.constant 0 : index
    %3 = vector.load %arg1[%c0, %c0_1, %c0_2] : memref<2x16x256xbf16, #tpu.memory_space<vmem>>, vector<2x16x256xbf16>
    %4 = arith.extf %3 : vector<2x16x256xbf16> to vector<2x16x256xf32>
    %cst = arith.constant dense<0.000000e+00> : vector<2x16xf32>
    %5 = vector.multi_reduction <add>, %4, %cst [2] : vector<2x16x256xf32> to vector<2x16xf32>
    %cst_3 = arith.constant 2.560000e+02 : f32
    %6 = vector.broadcast %cst_3 : f32 to vector<2x16xf32>
    %7 = arith.divf %5, %6 : vector<2x16xf32>
    %c0_4 = arith.constant 0 : index
    %c0_5 = arith.constant 0 : index
    %8 = vector.load %arg7[%c0_4, %c0_5] : memref<2x128xf32, #tpu.memory_space<vmem>>, vector<2x128xf32>
    %9 = arith.truncf %7 : vector<2x16xf32> to vector<2x16xbf16>
    %c0_6 = arith.constant 0 : index
    %c0_7 = arith.constant 0 : index
    %10 = vector.load %arg3[%c0_6, %c0_7] : memref<16x128xbf16, #tpu.memory_space<vmem>>, vector<16x128xbf16>
    %cst_8 = arith.constant dense<0.000000e+00> : vector<2x128xf32>
    %11 = tpu.matmul %9, %10, %cst_8 {dimension_numbers = #tpu.dot_dimension_numbers<[1], [0], [0], [1], [0, 0, 1, 1], [], []>} : vector<2x16xbf16>, vector<16x128xbf16>, vector<2x128xf32> -> vector<2x128xf32>
    %12 = arith.addf %8, %11 : vector<2x128xf32>
    %c0_9 = arith.constant 0 : index
    %c0_10 = arith.constant 0 : index
    %13 = vector.load %arg7[%c0_9, %c0_10] : memref<2x128xf32, #tpu.memory_space<vmem>>, vector<2x128xf32>
    tpu.vector_store %arg7[%c0_9, %c0_10], %12 {strides = array<i32>} : memref<2x128xf32, #tpu.memory_space<vmem>>, vector<2x128xf32>,
    %c2_i32 = arith.constant 2 : i32
    %14 = arith.cmpi eq, %arg0, %c2_i32 : i32
    %15 = arith.extui %14 : i1 to i32
    %c0_i32_11 = arith.constant 0 : i32
    %16 = arith.cmpi ne, %15, %c0_i32_11 : i32
    scf.if %16 {
      %c0_12 = arith.constant 0 : index
      %c0_13 = arith.constant 0 : index
      %17 = vector.load %arg7[%c0_12, %c0_13] : memref<2x128xf32, #tpu.memory_space<vmem>>, vector<2x128xf32>
      %c0_14 = arith.constant 0 : index
      %c0_15 = arith.constant 0 : index
      %18 = vector.load %arg5[%c0_14, %c0_15] : memref<8x128xf32, #tpu.memory_space<vmem>>, vector<1x128xf32>
      %19 = vector.broadcast %18 : vector<1x128xf32> to vector<2x128xf32>
      %20 = arith.addf %17, %19 : vector<2x128xf32>
      %c0_16 = arith.constant 0 : index
      %c0_17 = arith.constant 0 : index
      %21 = vector.load %arg6[%c0_16, %c0_17] : memref<4x128xf32, #tpu.memory_space<vmem>>, vector<2x128xf32>
      tpu.vector_store %arg6[%c0_16, %c0_17], %20 {strides = array<i32>} : memref<4x128xf32, #tpu.memory_space<vmem>>, vector<2x128xf32>,
      %c0_18 = arith.constant 0 : index
      %c0_19 = arith.constant 0 : index
      %22 = vector.load %arg2[%c0_18, %c0_19] : memref<2x128xbf16, #tpu.memory_space<vmem>>, vector<2x128xbf16>
      %c0_20 = arith.constant 0 : index
      %c0_21 = arith.constant 0 : index
      %23 = vector.load %arg4[%c0_20, %c0_21] : memref<384x128xbf16, #tpu.memory_space<vmem>>, vector<128x128xbf16>
      %cst_22 = arith.constant dense<0.000000e+00> : vector<2x128xf32>
      %24 = tpu.matmul %22, %23, %cst_22 {dimension_numbers = #tpu.dot_dimension_numbers<[1], [0], [0], [1], [0, 0, 1, 1], [], []>} : vector<2x128xbf16>, vector<128x128xbf16>, vector<2x128xf32> -> vector<2x128xf32>
      %c1 = arith.constant 1 : index
      %c0_23 = arith.constant 0 : index
      %25 = vector.load %arg5[%c1, %c0_23] : memref<8x128xf32, #tpu.memory_space<vmem>>, vector<1x128xf32>
      %26 = vector.broadcast %25 : vector<1x128xf32> to vector<2x128xf32>
      %27 = arith.addf %24, %26 : vector<2x128xf32>
      %c2 = arith.constant 2 : index
      %c0_24 = arith.constant 0 : index
      %28 = vector.load %arg6[%c2, %c0_24] : memref<4x128xf32, #tpu.memory_space<vmem>>, vector<2x128xf32>
      tpu.vector_store %arg6[%c2, %c0_24], %27 {strides = array<i32>} : memref<4x128xf32, #tpu.memory_space<vmem>>, vector<2x128xf32>,
      %c0_25 = arith.constant 0 : index
      %c0_26 = arith.constant 0 : index
      %29 = vector.load %arg6[%c0_25, %c0_26] : memref<4x128xf32, #tpu.memory_space<vmem>>, vector<4x128xf32>
      %30 = arith.mulf %29, %29 : vector<4x128xf32>
      %cst_27 = arith.constant dense<0.000000e+00> : vector<4xf32>
      %31 = vector.multi_reduction <add>, %30, %cst_27 [1] : vector<4x128xf32> to vector<4xf32>
      %32 = vector.shape_cast %31 : vector<4xf32> to vector<4x1xf32>
      %cst_28 = arith.constant 9.99999996E-13 : f32
      %33 = vector.broadcast %cst_28 : f32 to vector<4x1xf32>
      %34 = arith.maximumf %32, %33 : vector<4x1xf32>
      %35 = math.rsqrt %34 : vector<4x1xf32>
      %36 = vector.broadcast %35 : vector<4x1xf32> to vector<4x128xf32>
      %37 = arith.mulf %29, %36 : vector<4x128xf32>
      %38 = arith.truncf %37 : vector<4x128xf32> to vector<4x128xbf16>
      %c128 = arith.constant 128 : index
      %c0_29 = arith.constant 0 : index
      %39 = vector.load %arg4[%c128, %c0_29] : memref<384x128xbf16, #tpu.memory_space<vmem>>, vector<128x128xbf16>
      %cst_30 = arith.constant dense<0.000000e+00> : vector<4x128xf32>
      %40 = tpu.matmul %38, %39, %cst_30 {dimension_numbers = #tpu.dot_dimension_numbers<[1], [0], [0], [1], [0, 0, 1, 1], [], []>} : vector<4x128xbf16>, vector<128x128xbf16>, vector<4x128xf32> -> vector<4x128xf32>
      %c2_31 = arith.constant 2 : index
      %c0_32 = arith.constant 0 : index
      %41 = vector.load %arg5[%c2_31, %c0_32] : memref<8x128xf32, #tpu.memory_space<vmem>>, vector<1x128xf32>
      %42 = vector.broadcast %41 : vector<1x128xf32> to vector<4x128xf32>
      %43 = arith.addf %40, %42 : vector<4x128xf32>
      %cst_33 = arith.constant 0.000000e+00 : f32
      %44 = vector.broadcast %cst_33 : f32 to vector<4x128xf32>
      %45 = arith.maximumf %43, %44 : vector<4x128xf32>
      %46 = arith.truncf %45 : vector<4x128xf32> to vector<4x128xbf16>
      %c256 = arith.constant 256 : index
      %c0_34 = arith.constant 0 : index
      %47 = vector.load %arg4[%c256, %c0_34] : memref<384x128xbf16, #tpu.memory_space<vmem>>, vector<128x128xbf16>
      %cst_35 = arith.constant dense<0.000000e+00> : vector<4x128xf32>
      %48 = tpu.matmul %46, %47, %cst_35 {dimension_numbers = #tpu.dot_dimension_numbers<[1], [0], [0], [1], [0, 0, 1, 1], [], []>} : vector<4x128xbf16>, vector<128x128xbf16>, vector<4x128xf32> -> vector<4x128xf32>
      %c3 = arith.constant 3 : index
      %c0_36 = arith.constant 0 : index
      %49 = vector.load %arg5[%c3, %c0_36] : memref<8x128xf32, #tpu.memory_space<vmem>>, vector<1x128xf32>
      %50 = vector.broadcast %49 : vector<1x128xf32> to vector<4x128xf32>
      %51 = arith.addf %48, %50 : vector<4x128xf32>
      %52 = tpu.iota {dimensions = array<i32: 0>} : vector<4x128xi32>
      %c2_i32_37 = arith.constant 2 : i32
      %53 = vector.broadcast %c2_i32_37 : i32 to vector<4x128xi32>
      %54 = arith.cmpi slt, %52, %53 : vector<4x128xi32>
      %c4 = arith.constant 4 : index
      %c0_38 = arith.constant 0 : index
      %55 = vector.load %arg5[%c4, %c0_38] : memref<8x128xf32, #tpu.memory_space<vmem>>, vector<1x128xf32>
      %c6 = arith.constant 6 : index
      %c0_39 = arith.constant 0 : index
      %56 = vector.load %arg5[%c6, %c0_39] : memref<8x128xf32, #tpu.memory_space<vmem>>, vector<1x128xf32>
      %57 = vector.shape_cast %55 : vector<1x128xf32> to vector<1x128xf32>
      %58 = vector.broadcast %57 : vector<1x128xf32> to vector<4x128xf32>
      %59 = vector.shape_cast %56 : vector<1x128xf32> to vector<1x128xf32>
      %60 = vector.broadcast %59 : vector<1x128xf32> to vector<4x128xf32>
      %61 = arith.select %54, %58, %60 : vector<4x128xi1>, vector<4x128xf32>
      %c5 = arith.constant 5 : index
      %c0_40 = arith.constant 0 : index
      %62 = vector.load %arg5[%c5, %c0_40] : memref<8x128xf32, #tpu.memory_space<vmem>>, vector<1x128xf32>
      %c7 = arith.constant 7 : index
      %c0_41 = arith.constant 0 : index
      %63 = vector.load %arg5[%c7, %c0_41] : memref<8x128xf32, #tpu.memory_space<vmem>>, vector<1x128xf32>
      %64 = vector.shape_cast %62 : vector<1x128xf32> to vector<1x128xf32>
      %65 = vector.broadcast %64 : vector<1x128xf32> to vector<4x128xf32>
      %66 = vector.shape_cast %63 : vector<1x128xf32> to vector<1x128xf32>
      %67 = vector.broadcast %66 : vector<1x128xf32> to vector<4x128xf32>
      %68 = arith.select %54, %65, %67 : vector<4x128xi1>, vector<4x128xf32>
      %69 = arith.mulf %51, %61 : vector<4x128xf32>
      %70 = arith.addf %69, %68 : vector<4x128xf32>
      %c0_42 = arith.constant 0 : index
      %c0_43 = arith.constant 0 : index
      %71 = vector.load %arg6[%c0_42, %c0_43] : memref<4x128xf32, #tpu.memory_space<vmem>>, vector<4x128xf32>
      tpu.vector_store %arg6[%c0_42, %c0_43], %70 {strides = array<i32>} : memref<4x128xf32, #tpu.memory_space<vmem>>, vector<4x128xf32>,
    } else {
    }
    return
  }
  func.func @transform_0(%arg0: i32) -> (i32, i32, i32) {
    %c0_i32 = arith.constant 0 : i32
    %c0_i32_0 = arith.constant 0 : i32
    %c0_i32_1 = arith.constant 0 : i32
    return %c0_i32, %arg0, %c0_i32_0 : i32, i32, i32
  }
  func.func @transform_1(%arg0: i32) -> (i32, i32) {
    %c0_i32 = arith.constant 0 : i32
    %c0_i32_0 = arith.constant 0 : i32
    %c0_i32_1 = arith.constant 0 : i32
    return %c0_i32, %c0_i32_0 : i32, i32
  }
  func.func @transform_2(%arg0: i32) -> (i32, i32) {
    %c0_i32 = arith.constant 0 : i32
    %c0_i32_0 = arith.constant 0 : i32
    return %arg0, %c0_i32 : i32, i32
  }
  func.func @transform_3(%arg0: i32) -> (i32, i32) {
    %c0_i32 = arith.constant 0 : i32
    %c0_i32_0 = arith.constant 0 : i32
    %c0_i32_1 = arith.constant 0 : i32
    return %c0_i32, %c0_i32_0 : i32, i32
  }
  func.func @transform_4(%arg0: i32) -> (i32, i32) {
    %c0_i32 = arith.constant 0 : i32
    %c0_i32_0 = arith.constant 0 : i32
    %c0_i32_1 = arith.constant 0 : i32
    return %c0_i32, %c0_i32_0 : i32, i32
  }
  func.func @transform_5(%arg0: i32) -> (i32, i32) {
    %c0_i32 = arith.constant 0 : i32
    %c0_i32_0 = arith.constant 0 : i32
    %c0_i32_1 = arith.constant 0 : i32
    return %c0_i32, %c0_i32_0 : i32, i32
  }
}

</mosaic_0001>

<bundles_post_ra>
// kernel: tpu_custom_call.1
= control target key start
LH: loop header
LB: loop body
LE: loop exit
PB: predicated region body
PF: predicated region fallthrough
CT: control target
= control target key end

     0   :  { %10 = vsyncpa [#allocation4], 0  ;;  %s1509_s0 = inlined_call_operand.hbm [shape: bf16[2,48,256], index: 0, kind: input, shape index: {}]   ;;  %s1510_s1 = inlined_call_operand.hbm [shape: bf16[2,128], index: 1, kind: input, shape index: {}]   ;;  %s1511_s2 = inlined_call_operand.hbm [shape: bf16[48,128], index: 2, kind: input, shape index: {}]   ;;  %s1512_s3 = inlined_call_operand.hbm [shape: bf16[384,128], index: 3, kind: input, shape index: {}]   ;;  %s1513_s4 = inlined_call_operand.hbm [shape: f32[8,128], index: 4, kind: input, shape index: {}]   ;;  %s1514_s5 = inlined_call_operand.hbm [shape: f32[4,128], index: 5, kind: output, shape index: {}]  }
   0x1   :  { %12 = vsyncpa [#allocation4 + $0x1], 0 }
   0x2   :  { %13 = vsyncpa [#allocation7], 0 }
   0x3   :  { %14 = vsyncpa [#allocation11], 0 }
   0x4   :  { %15 = vsyncpa [#allocation5], 0  ;;  %s1338_s18 = smov 0   ;;  %s1340_s19 = smov 0  }
   0x5   :  { %s1342_s20 = smov 0   ;;  %s1344_s21 = smov 0  }
   0x6 LB: > { %s1357_s22 = sadd.s32 4294967295, %s1290_s21   ;;  %s1360_s23 = sadd.s32 1, %s1290_s21   ;;  %s1290_s21 = sphi %s1344_s21, %s1522_s21   ;;  %s1286_s20 = sphi %s1342_s20, %s1521_s20   ;;  %s1282_s19 = sphi %s1340_s19, %s1520_s19   ;;  %s1278_s18 = sphi %s1338_s18, %s1519_s18  }
   0x7   : > { %s25_s24 = ssub.s32 %s1290_s21, %s1360_s23  ;;  %s28_s25 = sadd.s32 1, %s1286_s20 }
   0x8   : > { %p26_p0 = scmp.eq.s32.totalorder %s25_s24, 0  ;;  %p35_p1 = scmp.ne.s32.totalorder %s1286_s20, %s1282_s19 }
   0x9   : > { %p36_p2 = scmp.eq.s32.totalorder %s1290_s21, 0  ;;  %p41_p3 = scmp.ne.s32.totalorder %s1282_s19, %s1278_s18 }
   0xa   : > { %s1370_s26 = scalar_select %p26_p0, %s1286_s20, %s28_s25  }
   0xb   : > { %p1372_p4 = por %p36_p2, %p35_p1  ;;  %p42_p5 = scmp.eq.s32.totalorder %s1357_s22, 0 }
   0xc   : > { %p830_p6 = scmp.ge.s32.totalorder %s1290_s21, 1  ;;  %p162_p7 = scmp.lt.s32.totalorder %s1290_s21, 4 }
   0xd   : > { %p1381_p8 = por %p42_p5, %p41_p3  ;;  %p831_p9 = scmp.ne.s32.totalorder %s1357_s22, 0 }
   0xe   : > { %p1386_p10 = pnand %p830_p6, %p162_p7  ;;  %s174_s7 = sshll.u32 %s1510_s1, 4  ;;  %s175_s7 = int_to_ptr.hbm [resolvable:$true] %s174_s7 }
   0xf   : > { %s1292_s8 = smov [#allocation6]   ;;  %s185_s12 = sshll.u32 %s1512_s3, 4  ;;  %s186_s12 = int_to_ptr.hbm [resolvable:$true] %s185_s12 }
  0x10   : > { %p1012_p11 = pneg %p1386_p10  ;;  %s176_s9 = sshll.u32 %s1292_s8, 4  ;;  %s177_s9 = int_to_ptr.vmem [resolvable:$true] %s176_s9 }
  0x11   : > { %s1293_s14 = smov [#allocation9]   ;;  %s1294_s16 = smov 64  }
  0x12   : > { %p1400_p12 = pnand %p1012_p11, %p42_p5  ;;  %s187_s15 = sshll.u32 %s1293_s14, 4  ;;  %s188_s15 = int_to_ptr.vmem [resolvable:$true] %s187_s15 }
  0x13   : > { %s1295_s17 = smov 4   ;;  %s200_s25 = sshll.u32 %s1513_s4, 4  ;;  %s201_s25 = int_to_ptr.hbm [resolvable:$true] %s200_s25 }
  0x14   : > { %1015 = dma.hbm_to_vmem [thread:$0]  (!%p1400_p12), %s175_s7, 16, %s177_s9, [#allocation7]  }
  0x15   : > { %1018 = dma.hbm_to_vmem [thread:$0]  (!%p1400_p12), %s186_s12, 3072, %s188_s15, [#allocation7], %s1294_s16, %s1294_s16, %s1295_s17  }
  0x16   : > { %s1296_s30 = smov [#allocation10]   ;;  %p834_p13 = scmp.ge.s32.totalorder %s1290_s21, 3 }
  0x17   : > { %s202_s6 = sshll.u32 %s1296_s30, 4  ;;  %s203_s6 = int_to_ptr.vmem [resolvable:$true] %s202_s6 }
  0x18   : > { %1021 = dma.hbm_to_vmem [thread:$0]  (!%p1400_p12), %s201_s25, 128, %s203_s6, [#allocation11]  }
  0x19   : > { %209 = sbr.rel (%p834_p13) target bundleno = 60 (0x3c), region = 28 }
  0x1e   : > { %s213_s7 = sand.u32 1, %s1290_s21   ;;  %s215_s8 = sand.u32 1, %s1286_s20  }
  0x1f   : > { %s835_s9 = sshll.u32 %s215_s8, 5  ;;  %s958_s10 = sshll.u32 %s1290_s21, 4 }
  0x20   : > { %s223_s13 = scalar_lea.hbm %s1509_s0, %s958_s10  ;;  %s217_s14 = scalar_lea.vmem [#allocation3], %s835_s9 }
  0x21   : > { %s238_s15 = sshll.u32 %s217_s14, 4  ;;  %s236_s17 = sshll.u32 %s223_s13, 4  ;;  %s239_s15 = int_to_ptr.vmem [resolvable:$true] %s238_s15  ;;  %s237_s17 = int_to_ptr.hbm [resolvable:$true] %s236_s17 }
  0x22   : > { %s991_s16 = scalar_select %p1372_p4, [#allocation0], [#allocation15] }
  0x23   : > { %s1297_s24 = smov 768   ;;  %s1298_s25 = smov 256  }
  0x24   : > { %s228_s18 = sld [smem:[%s991_s16]]   ;;  %s1299_s30 = smov 2  }
  0x25   : > { %992 = sst [smem:[#allocation14]] (%p1372_p4), %s1297_s24  ;;  %s1300_s6 = smov 128  }
  0x26   : > { %993 = sst [smem:[#allocation14 + $0x1]] (%p1372_p4), %s1298_s25  ;;  %s1301_s11 = smov 8  }
  0x27   : > { %994 = sst [smem:[#allocation14 + $0x2]] (%p1372_p4), %s1299_s30  ;;  %s1436_s12 = scalar_lea.sflag [#allocation4], %s213_s7 }
  0x28   : > { %995 = sst [smem:[#allocation14 + $0x3]] (%p1372_p4), %s1300_s6  ;;  %s1302_s13 = smov [#allocation13]  }
  0x29   : > { %996 = sst [smem:[#allocation14 + $0x4]] (%p1372_p4), %s1300_s6  ;;  %s841_s14 = sshll.u32 %s215_s8, 3 }
  0x2a   : > { %s839_s9 = sshll.u32 %s228_s18, 26  ;;  %997 = sst [smem:[#allocation14 + $0x5]] (%p1372_p4), %s1301_s11 }
  0x2b   : > { %s840_s10 = sadd.s32 134217728, %s839_s9  ;;  %s959_s16 = sshll.u32 %s1290_s21, 3 }
  0x2c   : > { %998 = dma.general (%p1372_p4), %s237_s17, 512, %s239_s15, %s1436_s12, %s1302_s13, [#allocation14], %s840_s10, 0  }
  0x2d   : > { %s270_s25 = scalar_lea.hbm %s1511_s2, %s959_s16  ;;  %s265_s6 = scalar_lea.vmem [#allocation8], %s841_s14 }
  0x2e   : > { %s271_s30 = sshll.u32 %s270_s25, 4  ;;  %s273_s9 = sshll.u32 %s265_s6, 4  ;;  %s272_s30 = int_to_ptr.hbm [resolvable:$true] %s271_s30  ;;  %s274_s9 = int_to_ptr.vmem [resolvable:$true] %s273_s9 }
  0x2f   : > { %s1180_s7 = sshra.s32 %s272_s30, 4  ;;  %s1186_s21 = scalar_lea.hbm %s1511_s2, 24  ;;  %s1181_s7 = int_to_ptr.hbm [resolvable:$true] %s1180_s7 }
  0x30   : > { %s1182_s11 = scalar_lea.hbm %s1181_s7, 8  ;;  %p1187_p3 = scmp.lt.s32.totalorder %s1181_s7, %s1511_s2 }
  0x31   : > { %p1183_p0 = scmp.ne.s32.totalorder %s1181_s7, %s1182_s11  ;;  %p1188_p6 = scmp.lt.s32.totalorder %s1186_s21, %s1182_s11 }
  0x33   : > { %p1184_p1 = pnand %p1183_p0, %p1372_p4  ;;  %p1189_p7 = por %p1188_p6, %p1187_p3 }
  0x35   : > { %p1185_p2 = pneg %p1184_p1 }
  0x37   : > { %p1190_p11 = pnand %p1189_p7, %p1185_p2 }
  0x39   : > { %1193 = shalt.err (!%p1190_p11)
}
  0x3a   : > { %s1303_s13 = smov 64   ;;  %s1304_s14 = smov 4  }
  0x3b   : > { %999 = dma.hbm_to_vmem [thread:$0]  (%p1372_p4), %s272_s30, 128, %s274_s9, %s1436_s12, %s1303_s13, %s1303_s13, %s1304_s14  }
  0x3c PF: > { %285 = sbr.rel (%p1386_p10) target bundleno = 945 (0x3b1), region = 40  ;;  %s287_s16 = sand.u32 (!%p1386_p10), 1, %s1357_s22  }
  0x3d   : > { %s289_s24 = sand.u32 (!%p1386_p10), 1, %s1282_s19   ;;  %s288_s25 = scalar_lea.sflag (!%p1386_p10), [#allocation4], %s287_s16 }
  0x3e   : > { %s845_s18 = sshll.u32 (!%p1386_p10), %s289_s24, 5 }
  0x3f   : > { %s291_s6 = scalar_lea.vmem (!%p1386_p10), [#allocation3], %s845_s18 }
  0x41   : > { %1253 = dma.done.wait (%p1381_p8), %s288_s25, 512  }
  0x42   : > { %1255 = vsyncadd (%p1381_p8), %s288_s25, 4294966784 }
  0x43   : > { %1257 = dma.done.wait (%p42_p5), [#allocation7], 16  }
  0x44   : > { %1259 = vsyncadd (%p42_p5), [#allocation7], 4294967280  ;;  %s1470_s27 = sshll.u32 %s289_s24, 3 }
  0x45   : > { %s306_s29 = scalar_lea.vmem [#allocation8], %s1470_s27 }
  0x46   : > { %1261 = dma.done.wait (%p1381_p8), %s288_s25, 128  }
  0x47   : > { %1263 = vsyncadd (%p1381_p8), %s288_s25, 4294967168 }
  0x48   : > { %1265 = dma.done.wait (%p42_p5), [#allocation7], 3072  }
  0x49   : > { %1267 = vsyncadd (%p42_p5), [#allocation7], 4294964224 }
  0x4a   : > { %1269 = dma.done.wait (%p42_p5), [#allocation11], 128  }
  0x4b   : > { %1271 = vsyncadd (%p42_p5), [#allocation11], 4294967168  ;;  %350 = sbr.rel (%p831_p9) target bundleno = 82 (0x52), region = 64 }
  0x50   : > { %v1305_v0 = vmov 0.0  }
  0x51   : > { %351 = vst [vmem:[#allocation2] sm:$0x3] %v1305_v0 }
  0x52 PF: > { %v354_v1 = vld [vmem:[%s291_s6 + $0x10] sm:$0xff]  ;;  %v352_v2 = vld [vmem:[%s291_s6] sm:$0xff]  ;;  %v355_v7 = vld [vmem:[%s291_s6 + $0x18] sm:$0xff]  ;;  %v1306_v17 = vmov 256.0   ;;  %v398_v26 = vlaneseq  ;;  %vm403_vm1 = vcmask 130112   ;;  %vm408_vm2 = vcmask 1041409  }
  0x53   : > { %v360_v3 = vunpack.c.l.bf16 %v354_v1  ;;  %v361_v4 = vunpack.c.h.bf16 %v354_v1  ;;  %v356_v5 = vunpack.c.l.bf16 %v352_v2  ;;  %v357_v6 = vunpack.c.h.bf16 %v352_v2  ;;  %v353_v8 = vld [vmem:[%s291_s6 + $0x8] sm:$0xff]  ;;  %p856_p4 = scmp.ne.s32.totalorder %s1357_s22, 2 }
  0x54   : > { %v362_v11 = vunpack.c.l.bf16 %v355_v7  ;;  %v363_v12 = vunpack.c.h.bf16 %v355_v7  ;;  %v358_v13 = vunpack.c.l.bf16 %v353_v8  ;;  %v359_v14 = vunpack.c.h.bf16 %v353_v8  ;;  %v960_v18 = vld [vmem:[%s306_s29] sm:$0xff] }
  0x55   : > { %v370_v9 = vadd.f32 %v361_v4, %v360_v3  ;;  %v364_v10 = vadd.f32 %v357_v6, %v356_v5  ;;  %1078 = vrcp.f32 %v1306_v17  ;;  %428 = vmatpush.bf16.msra.mxu0 %v960_v18  ;;  %v399_v28 = vand.u32 127, %v398_v26 }
  0x56   : > { %v373_v15 = vadd.f32 %v363_v12, %v362_v11  ;;  %v367_v16 = vadd.f32 %v359_v14, %v358_v13  ;;  %vm417_vm3 = vcmask 130048  }
  0x57   : > { %371 = vadd.xlane.f32.xlu1 %v370_v9  ;;  %365 = vadd.xlane.f32.xlu0 %v364_v10  ;;  %v401_v35 = vadd.s32 4294967288, %v399_v28 }
  0x58   : > { %v387_v50 = vld [vmem:[#allocation2] sm:$0x3] }
  0x5b   : > { %v1079_v19 = vpop.eup %1078 }
  0x5c   : > { %v377_v20 = vmul.f32 256.0, %v1079_v19  ;;  %vm381_vm0 = vweird.f32 %v1079_v19 }
  0x5e   : > { %v378_v21 = vsub.f32 1.0, %v377_v20 }
  0x5f   : > { %374 = vadd.xlane.f32.xlu1 %v373_v15  ;;  %368 = vadd.xlane.f32.xlu0 %v367_v16 }
  0x60   : > { %v379_v22 = vmul.f32 %v1079_v19, %v378_v21 }
  0x62   : > { %v380_v25 = vadd.f32 %v1079_v19, %v379_v22 }
  0x64   : > { %v382_v27 = vsel %vm381_vm0, %v1079_v19, %v380_v25 }
  0xca   : > { %v372_v23 = vpop.xlane.xlu1 %371  ;;  %v366_v24 = vpop.xlane.xlu0 %365 }
  0xcb   : > { %v385_v31 = vmul.f32 %v382_v27, %v372_v23  ;;  %v383_v32 = vmul.f32 %v382_v27, %v366_v24 }
  0xd2   : > { %v375_v29 = vpop.xlane.xlu1 %374  ;;  %v369_v30 = vpop.xlane.xlu0 %368 }
  0xd3   : > { %v386_v33 = vmul.f32 %v382_v27, %v375_v29  ;;  %v384_v34 = vmul.f32 %v382_v27, %v369_v30 }
  0xd5   : > { %v389_v36 = vpack.c.bf16 %v386_v33, %v385_v31  ;;  %v388_v37 = vpack.c.bf16 %v384_v34, %v383_v32 }
  0xd7   : > { %v396_v38 = vunpack.c.l.b16 %v389_v36  ;;  %v397_v39 = vunpack.c.h.b16 %v389_v36  ;;  %v394_v40 = vunpack.c.l.b16 %v388_v37  ;;  %v395_v41 = vunpack.c.h.b16 %v388_v37 }
  0xd9   : > { %v405_v42 = vperm.slane %v396_v38, %v399_v28  ;;  %v406_v43 = vperm.slane %v397_v39, %v401_v35  ;;  %v400_v44 = vperm.slane %v394_v40, %v399_v28  ;;  %v402_v45 = vperm.slane %v395_v41, %v401_v35 }
  0xdb   : > { %v404_v46 = vsel %vm403_vm1, %v402_v45, %v400_v44  ;;  %v407_v47 = vsel %vm403_vm1, %v406_v43, %v405_v42 }
  0xdc   : > { %v409_v48 = vsel %vm408_vm2, %v407_v47, %v404_v46 }
  0xdd   : > { %v410_v49 = vpack.c.b16 %v409_v48, %v409_v48 }
  0xdf   : > { %855 = vmatmul.msk.bf16.vlgmr.msra.gmra.mxu0 %vm417_vm3, %v410_v49 }
 0x15c   : > { %v430_v51 = vpop.f32.mrf.mxu0 }
 0x15d   : > { %v434_v52 = vadd.f32 %v430_v51, %v387_v50 }
 0x15f   : > { %435 = vst [vmem:[#allocation2] sm:$0x3] %v434_v52 }
 0x160   : > { %439 = sbr.rel (%p856_p4) target bundleno = 940 (0x3ac), region = 68 }
 0x164   : > { %v432_v53 = vpop.f32.mrf.mxu0 }
 0x165   : > { %v968_v54 = vld [vmem:[#allocation9 + $0x38] sm:$0xff]  ;;  %v967_v55 = vld [vmem:[#allocation9 + $0x30] sm:$0xff]  ;;  %v966_v56 = vld [vmem:[#allocation9 + $0x28] sm:$0xff]  ;;  %vm528_vm4 = vcmask 1043456   ;;  %v706_v43 = vshrl.u32 %v398_v26, 7 }
 0x166   : > { %512 = vmatpush.bf16.msra.mxu0 %v968_v54  ;;  %v965_v57 = vld [vmem:[#allocation9 + $0x20] sm:$0xff]  ;;  %v964_v58 = vld [vmem:[#allocation9 + $0x18] sm:$0xff]  ;;  %v963_v59 = vld [vmem:[#allocation9 + $0x10] sm:$0xff] }
 0x167   : > { %v962_v60 = vld [vmem:[#allocation9 + $0x8] sm:$0xff]  ;;  %v961_v61 = vld [vmem:[#allocation9] sm:$0xff]  ;;  %v976_v2 = vld [vmem:[#allocation9 + $0x78] sm:$0xff]  ;;  %vm707_vm8 = vcmp.lt.s32.totalorder %v706_v43, 2 }
 0x168   : > { %v445_v62 = vld [vmem:[#allocation6] sm:$0x1]  ;;  %v1081_v63 = vld [vmem:[#allocation10] ss:$0 sm:$0xff]  ;;  %v440_v0 = vld [vmem:[#allocation2] sm:$0x3]  ;;  %611 = vmatpush.bf16.msra.mxu1 %v976_v2 }
 0x169   : > { %v443_v1 = vadd.f32 %v1081_v63, %v440_v0  ;;  %v975_v3 = vld [vmem:[#allocation9 + $0x70] sm:$0xff]  ;;  %v1080_v4 = vld [vmem:[#allocation10 + $0x1] ss:$0 sm:$0xff]  ;;  %v974_v11 = vld [vmem:[#allocation9 + $0x68] sm:$0xff] }
 0x16a   : > { %513 = vmatpush.bf16.msra.mxu0 %v967_v55  ;;  %v973_v12 = vld [vmem:[#allocation9 + $0x60] sm:$0xff]  ;;  %v972_v13 = vld [vmem:[#allocation9 + $0x58] sm:$0xff]  ;;  %v971_v14 = vld [vmem:[#allocation9 + $0x50] sm:$0xff] }
 0x16b   : > { %444 = vst [vmem:[#allocation12] sm:$0x3] %v443_v1  ;;  %v970_v15 = vld [vmem:[#allocation9 + $0x48] sm:$0xff]  ;;  %v969_v16 = vld [vmem:[#allocation9 + $0x40] sm:$0xff]  ;;  %v984_v17 = vld [vmem:[#allocation9 + $0xb8] sm:$0xff] }
 0x16c   : > { %612 = vmatpush.bf16.msra.mxu1 %v975_v3  ;;  %692 = vmatpush.bf16.msra.mxu2 %v984_v17  ;;  %v983_v18 = vld [vmem:[#allocation9 + $0xb0] sm:$0xff]  ;;  %v982_v19 = vld [vmem:[#allocation9 + $0xa8] sm:$0xff]  ;;  %v981_v22 = vld [vmem:[#allocation9 + $0xa0] sm:$0xff] }
 0x16d   : > { %v980_v23 = vld [vmem:[#allocation9 + $0x98] sm:$0xff]  ;;  %v979_v27 = vld [vmem:[#allocation9 + $0x90] sm:$0xff]  ;;  %v978_v35 = vld [vmem:[#allocation9 + $0x88] sm:$0xff] }
 0x16e   : > { %514 = vmatpush.bf16.msra.mxu0 %v966_v56  ;;  %v977_v36 = vld [vmem:[#allocation9 + $0x80] sm:$0xff] }
 0x16f   : > { %v1082_v37 = vld [vmem:[#allocation10 + $0x2] ss:$0 sm:$0xff]  ;;  %v1084_v44 = vld [vmem:[#allocation10 + $0x4] ss:$0 sm:$0xff]  ;;  %v1085_v45 = vld [vmem:[#allocation10 + $0x6] ss:$0 sm:$0xff] }
 0x170   : > { %613 = vmatpush.bf16.msra.mxu1 %v974_v11  ;;  %693 = vmatpush.bf16.msra.mxu2 %v983_v18  ;;  %v1083_v46 = vld [vmem:[#allocation10 + $0x3] ss:$0 sm:$0xff]  ;;  %v1086_v47 = vld [vmem:[#allocation10 + $0x5] ss:$0 sm:$0xff]  ;;  %v1087_v48 = vld [vmem:[#allocation10 + $0x7] ss:$0 sm:$0xff]  ;;  %v712_v50 = vsel %vm707_vm8, %v1084_v44, %v1085_v45 }
 0x171   : > { %v717_v52 = vsel %vm707_vm8, %v1086_v47, %v1087_v48 }
 0x172   : > { %515 = vmatpush.bf16.msra.mxu0 %v965_v57 }
 0x174   : > { %614 = vmatpush.bf16.msra.mxu1 %v973_v12  ;;  %694 = vmatpush.bf16.msra.mxu2 %v982_v19 }
 0x176   : > { %516 = vmatpush.bf16.msra.mxu0 %v964_v58 }
 0x178   : > { %615 = vmatpush.bf16.msra.mxu1 %v972_v13  ;;  %695 = vmatpush.bf16.msra.mxu2 %v981_v22 }
 0x17a   : > { %517 = vmatpush.bf16.msra.mxu0 %v963_v59 }
 0x17c   : > { %616 = vmatpush.bf16.msra.mxu1 %v971_v14  ;;  %696 = vmatpush.bf16.msra.mxu2 %v980_v23 }
 0x17e   : > { %518 = vmatpush.bf16.msra.mxu0 %v962_v60 }
 0x180   : > { %617 = vmatpush.bf16.msra.mxu1 %v970_v15  ;;  %697 = vmatpush.bf16.msra.mxu2 %v979_v27 }
 0x182   : > { %519 = vmatpush.bf16.msra.mxu0 %v961_v61 }
 0x184   : > { %618 = vmatpush.bf16.msra.mxu1 %v969_v16  ;;  %698 = vmatpush.bf16.msra.mxu2 %v978_v35 }
 0x185   : > { %520 = vmatmul.bf16.vlgmr.msra.gmra.mxu0 %v445_v62 }
 0x188   : > { %699 = vmatpush.bf16.msra.mxu2 %v977_v36 }
 0x202   : > { %v521_v5 = vpop.f32.mrf.mxu0 }
 0x203   : > { %v522_v6 = vadd.f32 %v1080_v4, %v521_v5 }
 0x205   : > { %525 = vst [vmem:[#allocation12 + $0x2] sm:$0x3] %v522_v6 }
 0x20a   : > { %v523_v7 = vpop.f32.mrf.mxu0 }
 0x20c   : > { %v526_v8 = vld [vmem:[#allocation12] sm:$0xf] }
 0x20d   : > { %v527_v9 = vmul.f32 %v526_v8, %v526_v8 }
 0x20f   : > { %v529_v10 = vsel %vm528_vm4, %v527_v9, 0.0 }
 0x210   : > { %530 = vadd.xlane.f32.xlu0 %v529_v10 }
 0x283   : > { %v531_v20 = vpop.xlane.xlu0 %530 }
 0x284   : > { %v532_v21 = vmax.f32 %v531_v20, 1e-12 }
 0x286   : > { %1088 = vrsqrt.f32 %v532_v21  ;;  %vm539_vm6 = vweird.f32 %v532_v21 }
 0x28c   : > { %v1089_v24 = vpop.eup %1088 }
 0x28d   : > { %v534_v25 = vmul.f32 %v1089_v24, %v532_v21  ;;  %vm540_vm5 = vweird.f32 %v1089_v24 }
 0x28e   : > { %vm541_vm7 = vmor %vm539_vm6, %vm540_vm5 }
 0x28f   : > { %v535_v28 = vmul.f32 %v1089_v24, %v534_v25 }
 0x291   : > { %v536_v29 = vmul.f32 0.5, %v535_v28 }
 0x293   : > { %v537_v30 = vsub.f32 1.5, %v536_v29 }
 0x295   : > { %v538_v31 = vmul.f32 %v1089_v24, %v537_v30 }
 0x297   : > { %v542_v32 = vsel %vm541_vm7, %v1089_v24, %v538_v31 }
 0x298   : > { %v543_v33 = vmul.f32 %v542_v32, %v526_v8 }
 0x29a   : > { %v544_v34 = vpack.c.bf16 %v543_v33, %v543_v33 }
 0x29c   : > { %619 = vmatmul.bf16.vlgmr.msra.gmra.mxu1 %v544_v34 }
 0x319   : > { %v620_v38 = vpop.f32.mrf.mxu1 }
 0x31a   : > { %v621_v39 = vadd.f32 %v1082_v37, %v620_v38 }
 0x31c   : > { %v624_v40 = vmax.f32 %v621_v39, 0.0 }
 0x31e   : > { %v625_v41 = vpack.c.bf16 %v624_v40, %v624_v40 }
 0x320   : > { %700 = vmatmul.bf16.vlgmr.msra.gmra.mxu2 %v625_v41 }
 0x321   : > { %v622_v42 = vpop.f32.mrf.mxu1 }
 0x3a3   : > { %v701_v49 = vpop.f32.mrf.mxu2 }
 0x3a4   : > { %v702_v51 = vadd.f32 %v1083_v46, %v701_v49 }
 0x3a6   : > { %v718_v53 = vmul.f32 %v712_v50, %v702_v51 }
 0x3a8   : > { %v719_v54 = vadd.f32 %v718_v53, %v717_v52 }
 0x3aa   : > { %720 = vst [vmem:[#allocation12] sm:$0xf] %v719_v54 }
 0x3ab   : > { %v703_v55 = vpop.f32.mrf.mxu2 }
 0x3ac PF: > { %p1028_p5 = scmp.eq.s32.totalorder %s1357_s22, 2  ;;  %s1307_s28 = smov [#allocation12]  }
 0x3ad   : > { %s727_s12 = sshll.u32 %s1307_s28, 4  ;;  %s729_s7 = sshll.u32 %s1514_s5, 4  ;;  %s728_s12 = int_to_ptr.vmem [resolvable:$true] %s727_s12  ;;  %s730_s7 = int_to_ptr.hbm [resolvable:$true] %s729_s7 }
 0x3ae   : > { %1009 = dma.vmem_to_hbm [thread:$0]  (%p1028_p5), %s728_s12, 64, %s730_s7, [#allocation5]  }
 0x3af   : > { %1273 = dma.done.wait (%p1028_p5), [#allocation5], 64  }
 0x3b0   : > { %1275 = vsyncadd (%p1028_p5), [#allocation5], 4294967232 }
 0x3b1 PF: > { %p18_p8 = scmp.ge.s32.totalorder %s1360_s23, 5   ;;  %s1519_s18 = smov %s1282_s19 }
 0x3b2   : > { %s1520_s19 = smov %s1286_s20  ;;  %s1521_s20 = smov %s1370_s26 }
 0x3b3   : > { %s1522_s21 = smov %s1360_s23  ;;  %20 = sbr.rel (!%p18_p8) target bundleno = 6 (0x6), region = 113 }
 0x3b8   :  { %743 = vsyncpa [#allocation4], 1 }
 0x3b9   :  { %745 = vsyncpa [#allocation4 + $0x1], 1 }
 0x3ba   :  { %746 = vsyncpa [#allocation7], 1 }
 0x3bb   :  { %747 = vsyncpa [#allocation11], 1 }
 0x3bc   :  { %748 = vsyncpa [#allocation5], 1 }
 0x3bd   :  { %750 = vsyncpa [#allocation5 + $0x1], 1 }

</bundles_post_ra>
